<compile_context>
chip_gen: v6e
topology: v6e:2x2x1
jax: 0.10.0
libtpu: 0.0.40
codegen_flags: <defaults>
</compile_context>

<pallas_src>
import math

import jax
import jax.numpy as jnp
from jax.experimental import pallas as pl
from jax.experimental.pallas import tpu as pltpu

LANES = 128        # lane width
BLOCK_ROWS = 512   # max sublane rows per block: 512*128*4B = 256 KiB per f32 input
NUM_SPLITS = 2     # leading 'parallel' grid axis -> both TensorCores on v7x


def _block_rows(rows):
    # Multiple of 16 so both f32 (8-row) and bf16 (16-row) sublane packing
    # divide the block evenly; shrink for tiny inputs.
    return min(BLOCK_ROWS, ((rows + 15) // 16) * 16)


# ----------------------------------------------------------------------------
# Generic Pallas reduction over lane-dense (rows, 128) slabs
# ----------------------------------------------------------------------------
def _pallas_reduce(contrib_fn, *arrays):
    """sum(contrib_fn(mask, *f32 blocks)) over all in-range elements.

    `arrays` are identically shaped (rows, LANES) slabs.  `contrib_fn` must
    return zero contribution for masked (out-of-range) positions when a mask
    is supplied.
    """
    rows = arrays[0].shape[0]
    br = _block_rows(rows)
    nb = pl.cdiv(rows, br)             # real row-blocks in the array
    nbh = pl.cdiv(nb, NUM_SPLITS)      # row-blocks handled per core
    needs_mask = NUM_SPLITS * nbh * br != rows
    n_in = len(arrays)

    def kernel(*refs):
        in_refs = refs[:n_in]
        out_ref = refs[n_in]
        acc_ref = refs[n_in + 1]
        c = pl.program_id(0)
        i = pl.program_id(1)

        @pl.when(i == 0)
        def _():
            acc_ref[...] = jnp.zeros_like(acc_ref)

        blocks = [r[...].astype(jnp.float32) for r in in_refs]
        if needs_mask:
            row0 = (c * nbh + i) * br
            rid = row0 + jax.lax.broadcasted_iota(jnp.int32, (br, LANES), 0)
            mask = rid < rows
        else:
            mask = None
        acc_ref[...] += contrib_fn(mask, *blocks)   # pure VPU add per step

        @pl.when(i == nbh - 1)
        def _():
            # Single cross-block reduce, once per core: (br,128) -> (8,128).
            out_ref[0] = jnp.sum(
                acc_ref[...].reshape(br // 8, 8, LANES), axis=0)

    def in_map(c, i):
        b = c * nbh + i
        # Ghost / partial blocks are clamped to a valid block so the DMA stays
        # in bounds; the in-kernel row mask zeroes their contribution.
        return (jnp.minimum(b, nb - 1), 0)

    partials = pl.pallas_call(
        kernel,
        out_shape=jax.ShapeDtypeStruct((NUM_SPLITS, 8, LANES), jnp.float32),
        grid_spec=pltpu.PrefetchScalarGridSpec(
            num_scalar_prefetch=0,
            grid=(NUM_SPLITS, nbh),
            in_specs=[pl.BlockSpec((br, LANES), in_map) for _ in arrays],
            out_specs=pl.BlockSpec((1, 8, LANES), lambda c, i: (c, 0, 0)),
            scratch_shapes=[pltpu.VMEM((br, LANES), jnp.float32)],
        ),
        compiler_params=pltpu.CompilerParams(
            dimension_semantics=("parallel", "arbitrary")),
    )(*arrays)
    return jnp.sum(partials)


def _sse_contrib(mask, x, t):
    d = x - t
    dd = d * d
    if mask is not None:
        dd = jnp.where(mask, dd, 0.0)
    return dd


def _log_contrib(mask, p):
    if mask is not None:
        p = jnp.where(mask, p, 1.0)   # log(1) = 0 -> neutral
    return jnp.log(p)


def _as_rows(x, pad_value):
    """View a tensor as a lane-dense (rows, LANES) slab (dtype preserved)."""
    flat = x.reshape(-1)
    rem = flat.shape[0] % LANES
    if rem:
        # TODO(synk): this fallback materializes a copy; it is only hit when
        # numel % 128 != 0, which never happens for typical NCHW image tensors.
        flat = jnp.concatenate(
            [flat, jnp.full((LANES - rem,), pad_value, flat.dtype)])
    return flat.reshape(-1, LANES)


# ----------------------------------------------------------------------------
# Differentiable reduction wrappers (custom_vjp; backward is trivial JAX)
# ----------------------------------------------------------------------------
def _sum_sq_diff_impl(x, t):
    return _pallas_reduce(_sse_contrib, _as_rows(x, 0.0), _as_rows(t, 0.0))


@jax.custom_vjp
def pallas_sum_sq_diff(x, t):
    """sum((x - t)^2) over all elements (f32 accumulation)."""
    return _sum_sq_diff_impl(x, t)


def _ssd_fwd(x, t):
    return _sum_sq_diff_impl(x, t), (x, t)


def _ssd_bwd(res, g):
    x, t = res
    d = x.astype(jnp.float32) - t.astype(jnp.float32)
    gd = 2.0 * g * d
    return gd.astype(x.dtype), (-gd).astype(t.dtype)


pallas_sum_sq_diff.defvjp(_ssd_fwd, _ssd_bwd)


def _log_sum_impl(p):
    return _pallas_reduce(_log_contrib, _as_rows(p, 1.0))


@jax.custom_vjp
def pallas_log_sum(p):
    """sum(log(p)) over all elements (f32 accumulation)."""
    return _log_sum_impl(p)


def _ls_fwd(p):
    return _log_sum_impl(p), (p,)


def _ls_bwd(res, g):
    (p,) = res
    return ((g / p.astype(jnp.float32)).astype(p.dtype),)


pallas_log_sum.defvjp(_ls_fwd, _ls_bwd)


# ----------------------------------------------------------------------------
# RateDistortionLoss forward (metric='mse' path)
# ----------------------------------------------------------------------------
def rate_distortion_loss(output, target, *, lmbda=0.01, metric="mse",
                         return_type="all", multiplier=10):
    """JAX/Pallas port of RateDistortionLoss.forward.

    `output` is a dict with keys: 'x_hat' (N,C,H,W), 'likelihoods' (dict of
    tensors with values in (0,1]), 'norm_sum', 'y_norm1', 'q_norm' (scalars).
    `target` is (N,C,H,W).
    """
    if metric != "mse":
        # TODO(synk): ms-ssim metric (external `ms_ssim`, Gaussian-pyramid conv
        # stack) not ported; only the 'mse' metric path is implemented.
        raise NotImplementedError(f"{metric} is not implemented in this port")

    N, C, H, W = target.shape
    num_pixels = N * H * W
    out = {}

    # bpp_loss: all likelihood tensors fused into one pallas launch.
    liks = list(output["likelihoods"].values())
    if liks:
        if len(liks) == 1:
            flat = liks[0].reshape(-1)
        else:
            dt = jnp.result_type(*liks)
            flat = jnp.concatenate([l.reshape(-1).astype(dt) for l in liks])
        out["bpp_loss"] = pallas_log_sum(flat) / (-math.log(2) * num_pixels)
    else:
        out["bpp_loss"] = jnp.float32(0.0)

    # mse_loss = mean((x_hat - target)^2)
    sse = pallas_sum_sq_diff(output["x_hat"], target)
    mse_loss = sse / jnp.float32(N * C * H * W)
    out["mse_loss"] = mse_loss

    distortion = (255.0 ** 2) * mse_loss
    out["loss"] = (lmbda * distortion + out["bpp_loss"]
                   + multiplier * output["norm_sum"])
    out["ms_ssim"] = -10.0 * jnp.log10(distortion)
    out["y_norm1"] = output["y_norm1"]
    out["norm_sum"] = output["norm_sum"]
    out["q_norm"] = output["q_norm"]

    if return_type == "all":
        return out
    return out[return_type]


# ----------------------------------------------------------------------------
# Demo / self-check
# ----------------------------------------------------------------------------
if __name__ == "__main__":
    key = jax.random.PRNGKey(0)
    k_tgt, k_xhat, k_ly, k_lz = jax.random.split(key, 4)

    N, C, H, W = 2, 3, 16, 16
    target = jax.random.uniform(k_tgt, (N, C, H, W), dtype=jnp.float32)
    x_hat = jnp.clip(
        target + 0.05 * jax.random.normal(k_xhat, (N, C, H, W),
                                          dtype=jnp.float32),
        0.0, 1.0)

    # Synthetic entropy-model likelihoods in (0, 1].
    lik_y = jax.random.uniform(k_ly, (N, 8, H // 4, W // 4),
                               dtype=jnp.float32, minval=0.05, maxval=1.0)
    lik_z = jax.random.uniform(k_lz, (N, 8, H // 8, W // 8),
                               dtype=jnp.float32, minval=0.05, maxval=1.0)

    output = {
        "x_hat": x_hat,
        "likelihoods": {"y": lik_y, "z": lik_z},
        "norm_sum": jnp.float32(0.123),
        "y_norm1": jnp.float32(3.456),
        "q_norm": jnp.float32(0.789),
    }

    out = rate_distortion_loss(output, target, lmbda=0.01, metric="mse",
                               return_type="all", multiplier=10)
    out = jax.block_until_ready(out)

    # --- forward reference check (pure JAX) ---
    num_pixels = N * H * W
    ref_bpp = sum(
        jnp.sum(jnp.log(l)) / (-math.log(2) * num_pixels)
        for l in output["likelihoods"].values())
    ref_mse = jnp.mean((x_hat - target) ** 2)
    ref_loss = (0.01 * (255.0 ** 2) * ref_mse + ref_bpp
                + 10 * output["norm_sum"])
    assert jnp.allclose(out["bpp_loss"], ref_bpp, rtol=1e-5, atol=1e-6)
    assert jnp.allclose(out["mse_loss"], ref_mse, rtol=1e-5, atol=1e-7)
    assert jnp.allclose(out["loss"], ref_loss, rtol=1e-5, atol=1e-5)

    # --- backward (custom_vjp) reference check ---
    def loss_fn(xh, ly, lz):
        o = dict(output, x_hat=xh, likelihoods={"y": ly, "z": lz})
        return rate_distortion_loss(o, target, lmbda=0.01, metric="mse",
                                    return_type="loss", multiplier=10)

    def ref_loss_fn(xh, ly, lz):
        bpp = ((jnp.sum(jnp.log(ly)) + jnp.sum(jnp.log(lz)))
               / (-math.log(2) * num_pixels))
        mse = jnp.mean((xh - target) ** 2)
        return 0.01 * (255.0 ** 2) * mse + bpp + 10 * output["norm_sum"]

    grads = jax.grad(loss_fn, argnums=(0, 1, 2))(x_hat, lik_y, lik_z)
    ref_grads = jax.grad(ref_loss_fn, argnums=(0, 1, 2))(x_hat, lik_y, lik_z)
    grads = jax.block_until_ready(grads)
    for g, gr in zip(grads, ref_grads):
        assert jnp.allclose(g, gr, rtol=1e-4, atol=1e-6)

    print("KERNEL_OK")
</pallas_src>

<mosaic_0001>
module attributes {stable_mosaic.version = 11 : i64} {
  func.func @kernel(%arg0: i32, %arg1: i32, %arg2: memref<16x128xf32, #tpu.memory_space<vmem>>, %arg3: memref<1x8x128xf32, #tpu.memory_space<vmem>>, %arg4: memref<16x128xf32, #tpu.memory_space<vmem>>) attributes {dimension_semantics = [#tpu.dimension_semantics<parallel>, #tpu.dimension_semantics<arbitrary>], iteration_bounds = array<i64: 2, 1>, scalar_prefetch = 0 : i64, scratch_operands = 1 : i64, tpu.core_type = #tpu.core_type<tc>, window_params = [{transform_indices = @transform_0, window_bounds = array<i64: 16, 128>}, {transform_indices = @transform_1, window_bounds = array<i64: 1, 8, 128>}]} {
    %c0_i32 = arith.constant 0 : i32
    %0 = arith.cmpi eq, %arg1, %c0_i32 : i32
    %1 = arith.extui %0 : i1 to i32
    %c0_i32_0 = arith.constant 0 : i32
    %2 = arith.cmpi ne, %1, %c0_i32_0 : i32
    scf.if %2 {
      %cst_8 = arith.constant 0.000000e+00 : f32
      %21 = vector.broadcast %cst_8 : f32 to vector<16x128xf32>
      %c0_9 = arith.constant 0 : index
      %c0_10 = arith.constant 0 : index
      %22 = vector.load %arg4[%c0_9, %c0_10] : memref<16x128xf32, #tpu.memory_space<vmem>>, vector<16x128xf32>
      tpu.vector_store %arg4[%c0_9, %c0_10], %21 {strides = array<i32>} : memref<16x128xf32, #tpu.memory_space<vmem>>, vector<16x128xf32>,
    } else {
    }
    %c0 = arith.constant 0 : index
    %c0_1 = arith.constant 0 : index
    %3 = vector.load %arg2[%c0, %c0_1] : memref<16x128xf32, #tpu.memory_space<vmem>>, vector<16x128xf32>
    %c1_i32 = arith.constant 1 : i32
    %4 = arith.muli %arg0, %c1_i32 : i32
    %5 = arith.addi %4, %arg1 : i32
    %c16_i32 = arith.constant 16 : i32
    %6 = arith.muli %5, %c16_i32 : i32
    %7 = tpu.iota {dimensions = array<i32: 0>} : vector<16x128xi32>
    %8 = vector.broadcast %6 : i32 to vector<16x128xi32>
    %9 = arith.addi %8, %7 : vector<16x128xi32>
    %c3_i32 = arith.constant 3 : i32
    %10 = vector.broadcast %c3_i32 : i32 to vector<16x128xi32>
    %11 = arith.cmpi slt, %9, %10 : vector<16x128xi32>
    %c0_2 = arith.constant 0 : index
    %c0_3 = arith.constant 0 : index
    %12 = vector.load %arg4[%c0_2, %c0_3] : memref<16x128xf32, #tpu.memory_space<vmem>>, vector<16x128xf32>
    %cst = arith.constant 1.000000e+00 : f32
    %13 = vector.broadcast %cst : f32 to vector<16x128xf32>
    %14 = arith.select %11, %3, %13 : vector<16x128xi1>, vector<16x128xf32>
    %15 = math.log %14 : vector<16x128xf32>
    %16 = arith.addf %12, %15 : vector<16x128xf32>
    %c0_4 = arith.constant 0 : index
    %c0_5 = arith.constant 0 : index
    %17 = vector.load %arg4[%c0_4, %c0_5] : memref<16x128xf32, #tpu.memory_space<vmem>>, vector<16x128xf32>
    tpu.vector_store %arg4[%c0_4, %c0_5], %16 {strides = array<i32>} : memref<16x128xf32, #tpu.memory_space<vmem>>, vector<16x128xf32>,
    %c0_i32_6 = arith.constant 0 : i32
    %18 = arith.cmpi eq, %arg1, %c0_i32_6 : i32
    %19 = arith.extui %18 : i1 to i32
    %c0_i32_7 = arith.constant 0 : i32
    %20 = arith.cmpi ne, %19, %c0_i32_7 : i32
    scf.if %20 {
      %c0_8 = arith.constant 0 : index
      %c0_9 = arith.constant 0 : index
      %21 = vector.load %arg4[%c0_8, %c0_9] : memref<16x128xf32, #tpu.memory_space<vmem>>, vector<16x128xf32>
      %22 = vector.shape_cast %21 : vector<16x128xf32> to vector<2x8x128xf32>
      %cst_10 = arith.constant dense<0.000000e+00> : vector<8x128xf32>
      %23 = vector.multi_reduction <add>, %22, %cst_10 [0] : vector<2x8x128xf32> to vector<8x128xf32>
      %c0_11 = arith.constant 0 : index
      %c0_12 = arith.constant 0 : index
      %c0_13 = arith.constant 0 : index
      %24 = vector.load %arg3[%c0_11, %c0_12, %c0_13] : memref<1x8x128xf32, #tpu.memory_space<vmem>>, vector<1x8x128xf32>
      %25 = vector.shape_cast %24 : vector<1x8x128xf32> to vector<8x128xf32>
      %26 = vector.shape_cast %23 : vector<8x128xf32> to vector<1x8x128xf32>
      tpu.vector_store %arg3[%c0_11, %c0_12, %c0_13], %26 {strides = array<i32>} : memref<1x8x128xf32, #tpu.memory_space<vmem>>, vector<1x8x128xf32>,
    } else {
    }
    return
  }
  func.func @transform_0(%arg0: i32, %arg1: i32) -> (i32, i32) {
    %c1_i32 = arith.constant 1 : i32
    %0 = arith.muli %arg0, %c1_i32 : i32
    %1 = arith.addi %0, %arg1 : i32
    %c0_i32 = arith.constant 0 : i32
    %2 = arith.minsi %1, %c0_i32 : i32
    %c0_i32_0 = arith.constant 0 : i32
    %c0_i32_1 = arith.constant 0 : i32
    return %2, %c0_i32_0 : i32, i32
  }
  func.func @transform_1(%arg0: i32, %arg1: i32) -> (i32, i32, i32) {
    %c0_i32 = arith.constant 0 : i32
    %c0_i32_0 = arith.constant 0 : i32
    %c0_i32_1 = arith.constant 0 : i32
    return %arg0, %c0_i32, %c0_i32_0 : i32, i32, i32
  }
}

</mosaic_0001>

<bundles_post_ra>
// kernel: tpu_custom_call.1
= control target key start
LH: loop header
LB: loop body
LE: loop exit
PB: predicated region body
PF: predicated region fallthrough
CT: control target
= control target key end

     0   :  { %6 = vsyncpa [#allocation4], 0  ;;  %s685_s0 = inlined_call_operand.hbm [shape: f32[3,128], index: 0, kind: input, shape index: {}]   ;;  %s686_s1 = inlined_call_operand.hbm [shape: f32[2,8,128], index: 1, kind: output, shape index: {}]  }
   0x1   :  { %8 = vsyncpa [#allocation4 + $0x1], 0 }
   0x2   :  { %9 = vsyncpa [#allocation5], 0 }
   0x3   :  { %11 = vsyncpa [#allocation5 + $0x1], 0  ;;  %s546_s6 = smov 0   ;;  %s548_s7 = smov 0  }
   0x4   :  { %s550_s8 = smov 0   ;;  %s552_s9 = smov 0  }
   0x5   :  { %s554_s10 = smov 0   ;;  %s556_s11 = smov 0  }
   0x6   :  { %s558_s12 = smov 0   ;;  %s560_s13 = smov 0  }
   0x7 LB: > { %s295_s14 = sadd.s32 4294967295, %s530_s13   ;;  %s296_s15 = sadd.s32 4294967294, %s530_s13   ;;  %s530_s13 = sphi %s560_s13, %s17_s13   ;;  %s526_s12 = sphi %s558_s12, %s698_s12   ;;  %s522_s11 = sphi %s556_s11, %s697_s11   ;;  %s518_s10 = sphi %s554_s10, %s675_s10   ;;  %s514_s9 = sphi %s552_s9, %s696_s9   ;;  %s510_s8 = sphi %s550_s8, %s695_s8   ;;  %s506_s7 = sphi %s548_s7, %s694_s7   ;;  %s502_s6 = sphi %s546_s6, %s693_s6  }
   0x8   : > { %s29_s16 = sadd.s32 1, %s526_s12  ;;  %p499_p1 = scmp.ne.s32.totalorder %s518_s10, 0 }
   0x9   : > { %p31_p0 = scmp.ge.s32.totalorder %s29_s16, 2  ;;  %p50_p2 = scmp.eq.s32.totalorder %s530_s13, 0 }
   0xa   : > { %p55_p3 = scmp.ne.s32.totalorder %s518_s10, %s514_s9  ;;  %p56_p5 = scmp.eq.s32.totalorder %s295_s14, 0 }
   0xb   : > { %s700_s16 = smov (%p31_p0, %s29_s16), 0  ;;  %p592_p4 = por %p499_p1, %p50_p2 }
   0xc   : > { %p596_p6 = por %p56_p5, %p55_p3  ;;  %s65_s19 = ssub.s32 %s526_s12, %s700_s16 }
   0xd   : > { %p66_p7 = scmp.eq.s32.totalorder %s65_s19, 0  ;;  %s68_s20 = sadd.s32 1, %s510_s8 }
   0xe   : > { %p78_p8 = scmp.ne.s32.totalorder %s510_s8, %s506_s7  ;;  %p79_p9 = scmp.eq.s32.totalorder %s295_s14, 1 }
   0xf   : > { %s604_s21 = scalar_select %p66_p7, %s510_s8, %s68_s20  }
  0x10   : > { %p84_p10 = scmp.ne.s32.totalorder %s506_s7, %s502_s6  ;;  %p85_p11 = scmp.eq.s32.totalorder %s296_s15, 1 }
  0x11   : > { %p610_p12 = por %p79_p9, %p78_p8  ;;  %p687_p0 = scmp.ge.s32.totalorder %s530_s13, 2 }
  0x12   : > { %p614_p13 = por %p85_p11, %p84_p10 }
  0x13   : > { %101 = sbr.rel (%p687_p0) target bundleno = 47 (0x2f), region = 16 }
  0x18   : > { %104 = sbr.rel (!%p592_p4) target bundleno = 47 (0x2f), region = 20 }
  0x1d   : > { %118 = vsyncadd [#allocation4], 192  ;;  %s532_s24 = smov [#allocation3]   ;;  %s401_s28 = scalar_lea.hbm %s685_s0, 64 }
  0x1e   : > { %s123_s25 = sshll.u32 %s532_s24, 4  ;;  %p402_p1 = scmp.ne.s32.totalorder %s685_s0, %s401_s28  ;;  %s124_s25 = int_to_ptr.vmem [resolvable:$true] %s123_s25 }
  0x1f   : > { %p407_p2 = scmp.lt.s32.totalorder %s401_s28, %s401_s28 }
  0x21   : > { %p409_p3 = pnand %p407_p2, %p402_p1 }
  0x23   : > { %412 = shalt.err (!%p409_p3)
}
  0x24   : > { %s413_s2 = scalar_lea.vmem %s124_s25, 64  ;;  %s419_s3 = scalar_lea.vmem %s124_s25, 512 }
  0x25   : > { %p414_p5 = scmp.ne.s32.totalorder %s124_s25, %s413_s2  ;;  %p420_p7 = scmp.lt.s32.totalorder %s124_s25, %s124_s25 }
  0x26   : > { %p421_p4 = scmp.lt.s32.totalorder %s419_s3, %s413_s2 }
  0x28   : > { %p422_p8 = por %p421_p4, %p420_p7 }
  0x2a   : > { %p423_p9 = pnand %p422_p8, %p414_p5 }
  0x2c   : > { %426 = shalt.err (!%p423_p9)
}
  0x2d   : > { %s533_s4 = smov 64   ;;  %s534_s5 = smov 4  }
  0x2e   : > { %129 = dma.hbm_to_vmem [thread:$0]  %s685_s0, 64, %s124_s25, [#allocation4], %s533_s4, %s533_s4, %s534_s5  }
  0x2f PF: > { %p306_p10 = scmp.ge.s32.totalorder %s530_s13, 1  ;;  %p131_p11 = scmp.lt.s32.totalorder %s530_s13, 3 }
  0x31   : > { %p132_p1 = pnand %p306_p10, %p131_p11 }
  0x32   : > { %s137_s15 = sand.u32 (!%p132_p1), 1, %s518_s10  }
  0x33   : > { %135 = sbr.rel (%p132_p1) target bundleno = 98 (0x62), region = 24  ;;  %s307_s17 = sshll.u32 (!%p132_p1), %s137_s15, 4 }
  0x34   : > { %s138_s19 = scalar_lea.sflag (!%p132_p1), [#allocation4], %s137_s15  ;;  %s141_s20 = scalar_lea.vmem (!%p132_p1), [#allocation3], %s307_s17 }
  0x38   : > { %490 = dma.done.wait (%p596_p6), %s138_s19, 256  }
  0x39   : > { %492 = vsyncadd (%p596_p6), %s138_s19, 4294967040  ;;  %s309_s24 = sshll.u32 %s522_s11, 4  ;;  %v176_v0 = vlaneseq  ;;  %v172_v6 = vld [vmem:[%s141_s20] sm:$0xff]  ;;  %v173_v7 = vld [vmem:[%s141_s20 + $0x8] sm:$0xff]  ;;  %s157_s18 = sand.u32 1, %s506_s7  }
  0x3a   : > { %v179_v1 = vstv %s309_s24  ;;  %s308_s25 = sshll.u32 %s157_s18, 3  ;;  %s311_s28 = sshll.u32 %s522_s11, 7 }
  0x3b   : > { %v177_v2 = vshrl.u32 %v176_v0, 7  ;;  %s159_s26 = scalar_lea.vmem [#allocation6], %s308_s25  ;;  %s215_s2 = scalar_lea.hbm %s686_s1, %s311_s28 }
  0x3c   : > { %s217_s27 = sshll.u32 %s159_s26, 4  ;;  %s204_s3 = scalar_lea.sflag [#allocation5], %s157_s18  ;;  %s218_s27 = int_to_ptr.vmem [resolvable:$true] %s217_s27 }
  0x3d   : > { %v178_v3 = vadd.s32 8, %v177_v2  ;;  %v180_v4 = vadd.s32 %v179_v1, %v177_v2  ;;  %s427_s4 = scalar_lea.vmem %s218_s27, 128  ;;  %s535_s5 = smov [#allocation6]  }
  0x3e   : > { %p428_p6 = scmp.ne.s32.totalorder %s218_s27, %s427_s4  ;;  %s431_s9 = sshll.u32 %s535_s5, 4  ;;  %s432_s9 = int_to_ptr.vmem [resolvable:$false] %s431_s9 }
  0x3f   : > { %v181_v5 = vadd.s32 %v179_v1, %v178_v3  ;;  %vm182_vm0 = vcmp.lt.s32.totalorder %v180_v4, 3  ;;  %s433_s14 = scalar_lea.vmem %s432_s9, 256  ;;  %p434_p5 = scmp.lt.s32.totalorder %s218_s27, %s432_s9 }
  0x40   : > { %v186_v8 = vsel %vm182_vm0, %v172_v6, 1.0  ;;  %p429_p2 = pnand %p428_p6, %p610_p12  ;;  %p435_p7 = scmp.lt.s32.totalorder %s433_s14, %s427_s4 }
  0x41   : > { %vm183_vm1 = vcmp.lt.s32.totalorder %v181_v5, 3  ;;  %397 = vlog2.f32 %v186_v8 }
  0x42   : > { %v187_v9 = vsel %vm183_vm1, %v173_v7, 1.0  ;;  %p430_p3 = pneg %p429_p2  ;;  %p436_p4 = por %p435_p7, %p434_p5 }
  0x43   : > { %399 = vlog2.f32 %v187_v9 }
  0x44   : > { %p437_p8 = pnand %p436_p4, %p430_p3 }
  0x4e   : > { %v398_v10 = vpop.eup %397 }
  0x4f   : > { %v189_v12 = vmul.f32 0.6931472, %v398_v10 }
  0x50   : > { %v400_v11 = vpop.eup %399 }
  0x51   : > { %v191_v13 = vmul.f32 0.6931472, %v400_v11 }
  0x53   : > { %v201_v14 = vadd.f32 %v191_v13, %v189_v12 }
  0x55   : > { %202 = vst [vmem:[%s159_s26] sm:$0xff] %v201_v14 }
  0x56   : > { %440 = shalt.err (!%p437_p8)
}
  0x57   : > { %s441_s11 = scalar_lea.hbm %s215_s2, 128  ;;  %s445_s19 = scalar_lea.hbm %s686_s1, 256 }
  0x58   : > { %p442_p9 = scmp.ne.s32.totalorder %s215_s2, %s441_s11  ;;  %p446_p1 = scmp.lt.s32.totalorder %s215_s2, %s686_s1 }
  0x59   : > { %p447_p6 = scmp.lt.s32.totalorder %s445_s19, %s441_s11 }
  0x5a   : > { %p443_p10 = pnand %p442_p9, %p610_p12 }
  0x5b   : > { %p448_p2 = por %p447_p6, %p446_p1 }
  0x5c   : > { %p444_p11 = pneg %p443_p10 }
  0x5e   : > { %p449_p0 = pnand %p448_p2, %p444_p11 }
  0x60   : > { %452 = shalt.err (!%p449_p0)
}
  0x61   : > { %316 = dma.vmem_to_hbm [thread:$0]  (%p610_p12), %s218_s27, 128, %s215_s2, %s204_s3  }
  0x62 PF: > { %s229_s18 = sand.u32 1, %s502_s6   ;;  %p692_p3 = scmp.ge.s32.totalorder %s530_s13, 2 }
  0x63   : > { %s230_s25 = scalar_lea.sflag [#allocation5], %s229_s18 }
  0x64   : > { %p319_p5 = pnand %p692_p3, %p614_p13 }
  0x66   : > { %p320_p7 = pneg %p319_p5 }
  0x68   : > { %494 = dma.done.wait (%p320_p7), %s230_s25, 128  }
  0x69   : > { %496 = vsyncadd (%p320_p7), %s230_s25, 4294967168  ;;  %s17_s13 = sadd.s32 1, %s530_s13   ;;  %s693_s6 = smov %s506_s7 }
  0x6a   : > { %p14_p4 = scmp.ge.s32.totalorder %s17_s13, 4   ;;  %s694_s7 = smov %s510_s8 }
  0x6b   : > { %s695_s8 = smov %s604_s21  ;;  %s696_s9 = smov %s518_s10 }
  0x6c   : > { %s675_s10 = smov 0   ;;  %s697_s11 = smov %s526_s12 }
  0x6d   : > { %s698_s12 = smov %s700_s16  ;;  %16 = sbr.rel (!%p14_p4) target bundleno = 7 (0x7), region = 77 }
  0x72   :  { %235 = vsyncpa [#allocation4], 1 }
  0x73   :  { %237 = vsyncpa [#allocation4 + $0x1], 1 }
  0x74   :  { %238 = vsyncpa [#allocation5], 1 }
  0x75   :  { %240 = vsyncpa [#allocation5 + $0x1], 1 }

</bundles_post_ra>
